<compile_context>
chip_gen: v5e
topology: v5e:2x2
jax: 0.10.0
libtpu: 0.0.40
codegen_flags: <defaults>
</compile_context>

<pallas_src>
import jax
import jax.numpy as jnp
from jax import lax
from jax.experimental import pallas as pl
from jax.experimental.pallas import tpu as pltpu


NEG_INF = float("-inf")


# ----------------------------- kernels --------------------------------------

def style_proj_kernel(s_ref, s_mean_ref, s_rstd_ref, wg_ref, bg_ref, who_ref,
                      g_ref, hp_ref):
    """Per style token tile: G = MVN(s) @ Wg + bg ; H' = s @ (Wh @ Wo)."""
    s = s_ref[...]                                            # (ts, Cp) f32
    sn = (s - s_mean_ref[...]) * s_rstd_ref[...]              # MVN in f32 (VPU)
    g = jnp.dot(sn.astype(jnp.bfloat16), wg_ref[...],
                preferred_element_type=jnp.float32) + bg_ref[...]
    g_ref[...] = g.astype(jnp.bfloat16)
    hp = jnp.dot(s.astype(jnp.bfloat16), who_ref[...],
                 preferred_element_type=jnp.float32)
    hp_ref[...] = hp.astype(jnp.bfloat16)


def sanet_attn_kernel(c_ref, c_mean_ref, c_rstd_ref, wf_ref, bf_ref,
                      g_ref, hp_ref, bho_ref, out_ref,
                      f_scr, m_scr, l_scr, acc_scr):
    """Flash-style attention over key tiles + out bias + residual."""
    ki = pl.program_id(2)

    @pl.when(ki == 0)
    def _init():
        # Query-side projection: computed once per (b, q-tile), kept in VMEM.
        cn = (c_ref[...] - c_mean_ref[...]) * c_rstd_ref[...]
        f = jnp.dot(cn.astype(jnp.bfloat16), wf_ref[...],
                    preferred_element_type=jnp.float32) + bf_ref[...]
        f_scr[...] = f.astype(jnp.bfloat16)
        m_scr[...] = jnp.full(m_scr.shape, NEG_INF, dtype=jnp.float32)
        l_scr[...] = jnp.zeros(l_scr.shape, dtype=jnp.float32)
        acc_scr[...] = jnp.zeros(acc_scr.shape, dtype=jnp.float32)

    # S block = F (tq, Cp) contracted with G tile (tk, Cp) on the channel dim —
    # no explicit transpose of G.
    s_blk = lax.dot_general(
        f_scr[...], g_ref[...],
        dimension_numbers=(((1,), (1,)), ((), ())),
        preferred_element_type=jnp.float32)                   # (tq, tk) f32

    # Online softmax update.
    m_prev = m_scr[...]
    m_new = jnp.maximum(m_prev, jnp.max(s_blk, axis=-1, keepdims=True))
    alpha = jnp.exp(m_prev - m_new)
    p = jnp.exp(s_blk - m_new)
    l_scr[...] = alpha * l_scr[...] + jnp.sum(p, axis=-1, keepdims=True)
    acc_scr[...] = alpha * acc_scr[...] + jnp.dot(
        p.astype(jnp.bfloat16), hp_ref[...], preferred_element_type=jnp.float32)
    m_scr[...] = m_new

    @pl.when(ki == pl.num_programs(2) - 1)
    def _finalize():
        inv_l = pl.reciprocal(l_scr[...], approx=True)        # EUP reciprocal
        out = acc_scr[...] * inv_l + bho_ref[...] + c_ref[...]  # +bias +residual
        out_ref[...] = out.astype(out_ref.dtype)


# ----------------------------- wrapper ---------------------------------------

def _pick_tile(n, target, align=8):
    """Largest divisor of n that is <= target and `align`-aligned (prefer align,
    then 8); falls back to n itself (full-extent block is always legal)."""
    t = min(target, n)
    for a in (align, 8):
        for cand in range(t, 0, -1):
            if n % cand == 0 and cand % a == 0:
                return cand
    return n


def sanet_forward(content, style, params, *, tq_target=256, tk_target=512):
    B, C, Hh, Ww = content.shape
    HW = Hh * Ww
    wf, bf, wg, bg, wh, bh, wo, bo = params

    Cp = ((C + 127) // 128) * 128          # lane-dense channel dim
    pad = Cp - C

    def pad_last(x):
        if pad == 0:
            return x
        widths = [(0, 0)] * (x.ndim - 1) + [(0, pad)]
        return jnp.pad(x, widths)

    def pad_w(w):
        if pad == 0:
            return w
        return jnp.pad(w, ((0, pad), (0, pad)))

    # Fold out_conv into the H projection (exact: softmax rows sum to 1).
    w_ho = jnp.dot(wh, wo)                 # (C, C)
    b_ho = jnp.dot(bh, wo) + bo            # (1, C)

    # NCHW -> token-major (B, HW, Cp);  hw index = h*W + w (matches torch .view)
    def to_tok(x):
        t = jnp.transpose(x, (0, 2, 3, 1)).reshape(B, HW, C).astype(jnp.float32)
        return pad_last(t)

    c_tok = to_tok(content)
    s_tok = to_tok(style)

    # Per-batch/channel mean and 1/std (unbiased variance + eps) — tiny (B,1,Cp)
    # reductions so the tiled kernels never need a global pass.
    # TODO(synk): NCHW<->NHWC relayout and these channel stats stay in XLA; they
    # are cheap transposes/reductions but could be folded into the kernel DMA
    # layout for a fully end-to-end NHWC pipeline.
    def stats(tok):
        mean = jnp.mean(tok, axis=1, keepdims=True)
        var = jnp.sum(jnp.square(tok - mean), axis=1, keepdims=True) / max(HW - 1, 1)
        return mean, lax.rsqrt(var + 1e-5)

    c_mean, c_rstd = stats(c_tok)
    s_mean, s_rstd = stats(s_tok)

    wf_p = pad_w(wf).astype(jnp.bfloat16)
    wg_p = pad_w(wg).astype(jnp.bfloat16)
    who_p = pad_w(w_ho).astype(jnp.bfloat16)
    bf_p = pad_last(bf).astype(jnp.float32)
    bg_p = pad_last(bg).astype(jnp.float32)
    bho_p = pad_last(b_ho).astype(jnp.float32)

    tq = _pick_tile(HW, tq_target, align=8)     # sublane-aligned query tiles
    tk = _pick_tile(HW, tk_target, align=128)   # lane-dense key tiles (score blk)
    ts = tk

    vmem_limit = 48 * 1024 * 1024          # safe on v5e/v6e/v7x, ample for tiles

    # ---- pass 1: style-side projections (G, H'), tiled over (B, token tiles) --
    g_tok, hp_tok = pl.pallas_call(
        style_proj_kernel,
        out_shape=(jax.ShapeDtypeStruct((B, HW, Cp), jnp.bfloat16),
                   jax.ShapeDtypeStruct((B, HW, Cp), jnp.bfloat16)),
        grid_spec=pltpu.PrefetchScalarGridSpec(
            num_scalar_prefetch=0,
            grid=(B, HW // ts),
            in_specs=[
                pl.BlockSpec((None, ts, Cp), lambda b, k: (b, k, 0)),   # style
                pl.BlockSpec((None, 1, Cp), lambda b, k: (b, 0, 0)),    # s_mean
                pl.BlockSpec((None, 1, Cp), lambda b, k: (b, 0, 0)),    # s_rstd
                pl.BlockSpec((Cp, Cp), lambda b, k: (0, 0)),            # Wg
                pl.BlockSpec((1, Cp), lambda b, k: (0, 0)),             # bg
                pl.BlockSpec((Cp, Cp), lambda b, k: (0, 0)),            # Wh@Wo
            ],
            out_specs=(
                pl.BlockSpec((None, ts, Cp), lambda b, k: (b, k, 0)),
                pl.BlockSpec((None, ts, Cp), lambda b, k: (b, k, 0)),
            ),
        ),
        compiler_params=pltpu.CompilerParams(
            dimension_semantics=("parallel", "parallel"),
            vmem_limit_bytes=vmem_limit),
    )(s_tok, s_mean, s_rstd, wg_p, bg_p, who_p)

    # ---- pass 2: flash attention + out bias + residual ------------------------
    out_tok = pl.pallas_call(
        sanet_attn_kernel,
        out_shape=jax.ShapeDtypeStruct((B, HW, Cp), jnp.float32),
        grid_spec=pltpu.PrefetchScalarGridSpec(
            num_scalar_prefetch=0,
            grid=(B, HW // tq, HW // tk),
            in_specs=[
                pl.BlockSpec((None, tq, Cp), lambda b, q, k: (b, q, 0)),  # content
                pl.BlockSpec((None, 1, Cp), lambda b, q, k: (b, 0, 0)),   # c_mean
                pl.BlockSpec((None, 1, Cp), lambda b, q, k: (b, 0, 0)),   # c_rstd
                pl.BlockSpec((Cp, Cp), lambda b, q, k: (0, 0)),           # Wf
                pl.BlockSpec((1, Cp), lambda b, q, k: (0, 0)),            # bf
                pl.BlockSpec((None, tk, Cp), lambda b, q, k: (b, k, 0)),  # G tile
                pl.BlockSpec((None, tk, Cp), lambda b, q, k: (b, k, 0)),  # H' tile
                pl.BlockSpec((1, Cp), lambda b, q, k: (0, 0)),            # b_ho
            ],
            out_specs=pl.BlockSpec((None, tq, Cp), lambda b, q, k: (b, q, 0)),
            scratch_shapes=[
                pltpu.VMEM((tq, Cp), jnp.bfloat16),   # F (query projection)
                pltpu.VMEM((tq, 1), jnp.float32),     # m (running max)
                pltpu.VMEM((tq, 1), jnp.float32),     # l (running denom)
                pltpu.VMEM((tq, Cp), jnp.float32),    # acc
            ],
        ),
        compiler_params=pltpu.CompilerParams(
            dimension_semantics=("parallel", "parallel", "arbitrary"),
            vmem_limit_bytes=vmem_limit),
    )(c_tok, c_mean, c_rstd, wf_p, bf_p, g_tok, hp_tok, bho_p)

    out_tok = out_tok[:, :, :C]                     # drop channel padding
    return jnp.transpose(out_tok.reshape(B, Hh, Ww, C), (0, 3, 1, 2))


# ----------------------------- reference & test -------------------------------

def sanet_reference(content, style, params):
    """Pure-JAX f32 reference mirroring the PyTorch forward."""
    wf, bf, wg, bg, wh, bh, wo, bo = params
    B, C, Hh, Ww = content.shape
    HW = Hh * Ww

    def mvn(x):
        xf = x.reshape(B, C, HW)
        mean = xf.mean(axis=2).reshape(B, C, 1, 1)
        var = xf.var(axis=2, ddof=1).reshape(B, C, 1, 1) + 1e-5
        return (x - mean) / jnp.sqrt(var)

    def conv1x1(x, w, b):
        return jnp.einsum('bihw,io->bohw', x, w) + b.reshape(1, C, 1, 1)

    Ff = conv1x1(mvn(content), wf, bf).reshape(B, C, HW).transpose(0, 2, 1)
    Gg = conv1x1(mvn(style), wg, bg).reshape(B, C, HW)
    Hh_ = conv1x1(style, wh, bh).reshape(B, C, HW)
    S = jnp.einsum('bij,bjk->bik', Ff, Gg)
    S = jax.nn.softmax(S, axis=-1)
    O = jnp.einsum('bcs,bqs->bcq', Hh_, S).reshape(B, C, Hh, Ww)
    O = conv1x1(O, wo, bo)
    return O + content


def init_params(key, C):
    ks = jax.random.split(key, 8)
    scale = 0.1
    wf = scale * jax.random.normal(ks[0], (C, C), jnp.float32)
    bf = scale * jax.random.normal(ks[1], (1, C), jnp.float32)
    wg = scale * jax.random.normal(ks[2], (C, C), jnp.float32)
    bg = scale * jax.random.normal(ks[3], (1, C), jnp.float32)
    wh = scale * jax.random.normal(ks[4], (C, C), jnp.float32)
    bh = scale * jax.random.normal(ks[5], (1, C), jnp.float32)
    wo = scale * jax.random.normal(ks[6], (C, C), jnp.float32)
    bo = scale * jax.random.normal(ks[7], (1, C), jnp.float32)
    return (wf, bf, wg, bg, wh, bh, wo, bo)


if __name__ == "__main__":
    key = jax.random.PRNGKey(0)
    k_c, k_s, k_p = jax.random.split(key, 3)

    B, C, H, W = 2, 4, 16, 16
    content = jax.random.normal(k_c, (B, C, H, W), jnp.float32)
    style = jax.random.normal(k_s, (B, C, H, W), jnp.float32)
    params = init_params(k_p, C)

    ref = jax.block_until_ready(sanet_reference(content, style, params))

    # Default tiles (single key tile at this toy size).
    out = jax.block_until_ready(sanet_forward(content, style, params))
    assert out.shape == (B, C, H, W)
    # bf16 MXU operands -> slightly looser tolerance than pure-f32.
    assert jnp.allclose(out, ref, atol=2e-2, rtol=2e-2), "mismatch vs reference"

    # Small tiles so the online-softmax key loop really runs multiple steps.
    out_tiled = jax.block_until_ready(
        sanet_forward(content, style, params, tq_target=64, tk_target=64))
    assert jnp.allclose(out_tiled, ref, atol=2e-2, rtol=2e-2), \
        "mismatch vs reference (tiled)"

    print("KERNEL_OK")
</pallas_src>

<mosaic_0001>
module attributes {stable_mosaic.version = 11 : i64} {
  func.func @style_proj_kernel(%arg0: i32, %arg1: i32, %arg2: memref<1x256x128xf32, #tpu.memory_space<vmem>>, %arg3: memref<1x1x128xf32, #tpu.memory_space<vmem>>, %arg4: memref<1x1x128xf32, #tpu.memory_space<vmem>>, %arg5: memref<128x128xbf16, #tpu.memory_space<vmem>>, %arg6: memref<1x128xf32, #tpu.memory_space<vmem>>, %arg7: memref<128x128xbf16, #tpu.memory_space<vmem>>, %arg8: memref<1x256x128xbf16, #tpu.memory_space<vmem>>, %arg9: memref<1x256x128xbf16, #tpu.memory_space<vmem>>) attributes {dimension_semantics = [#tpu.dimension_semantics<parallel>, #tpu.dimension_semantics<parallel>], iteration_bounds = array<i64: 2, 1>, scalar_prefetch = 0 : i64, scratch_operands = 0 : i64, tpu.core_type = #tpu.core_type<tc>, window_params = [{transform_indices = @transform_0, window_bounds = array<i64: 1, 256, 128>}, {transform_indices = @transform_1, window_bounds = array<i64: 1, 1, 128>}, {transform_indices = @transform_2, window_bounds = array<i64: 1, 1, 128>}, {pipeline_mode = #tpu.pipeline_mode<synchronous>, transform_indices = @transform_3, window_bounds = array<i64: 128, 128>}, {pipeline_mode = #tpu.pipeline_mode<synchronous>, transform_indices = @transform_4, window_bounds = array<i64: 1, 128>}, {pipeline_mode = #tpu.pipeline_mode<synchronous>, transform_indices = @transform_5, window_bounds = array<i64: 128, 128>}, {transform_indices = @transform_6, window_bounds = array<i64: 1, 256, 128>}, {transform_indices = @transform_7, window_bounds = array<i64: 1, 256, 128>}]} {
    %c0 = arith.constant 0 : index
    %c0_0 = arith.constant 0 : index
    %c0_1 = arith.constant 0 : index
    %0 = vector.load %arg2[%c0, %c0_0, %c0_1] : memref<1x256x128xf32, #tpu.memory_space<vmem>>, vector<1x256x128xf32>
    %1 = vector.shape_cast %0 : vector<1x256x128xf32> to vector<256x128xf32>
    %c0_2 = arith.constant 0 : index
    %c0_3 = arith.constant 0 : index
    %c0_4 = arith.constant 0 : index
    %2 = vector.load %arg3[%c0_2, %c0_3, %c0_4] : memref<1x1x128xf32, #tpu.memory_space<vmem>>, vector<1x1x128xf32>
    %3 = vector.shape_cast %2 : vector<1x1x128xf32> to vector<1x128xf32>
    %4 = vector.broadcast %3 : vector<1x128xf32> to vector<256x128xf32>
    %5 = arith.subf %1, %4 : vector<256x128xf32>
    %c0_5 = arith.constant 0 : index
    %c0_6 = arith.constant 0 : index
    %c0_7 = arith.constant 0 : index
    %6 = vector.load %arg4[%c0_5, %c0_6, %c0_7] : memref<1x1x128xf32, #tpu.memory_space<vmem>>, vector<1x1x128xf32>
    %7 = vector.shape_cast %6 : vector<1x1x128xf32> to vector<1x128xf32>
    %8 = vector.broadcast %7 : vector<1x128xf32> to vector<256x128xf32>
    %9 = arith.mulf %5, %8 : vector<256x128xf32>
    %10 = arith.truncf %9 : vector<256x128xf32> to vector<256x128xbf16>
    %c0_8 = arith.constant 0 : index
    %c0_9 = arith.constant 0 : index
    %11 = vector.load %arg5[%c0_8, %c0_9] : memref<128x128xbf16, #tpu.memory_space<vmem>>, vector<128x128xbf16>
    %cst = arith.constant dense<0.000000e+00> : vector<256x128xf32>
    %12 = tpu.matmul %10, %11, %cst {dimension_numbers = #tpu.dot_dimension_numbers<[1], [0], [0], [1], [0, 0, 1, 1], [], []>} : vector<256x128xbf16>, vector<128x128xbf16>, vector<256x128xf32> -> vector<256x128xf32>
    %c0_10 = arith.constant 0 : index
    %c0_11 = arith.constant 0 : index
    %13 = vector.load %arg6[%c0_10, %c0_11] : memref<1x128xf32, #tpu.memory_space<vmem>>, vector<1x128xf32>
    %14 = vector.broadcast %13 : vector<1x128xf32> to vector<256x128xf32>
    %15 = arith.addf %12, %14 : vector<256x128xf32>
    %16 = arith.truncf %15 : vector<256x128xf32> to vector<256x128xbf16>
    %c0_12 = arith.constant 0 : index
    %c0_13 = arith.constant 0 : index
    %c0_14 = arith.constant 0 : index
    %17 = vector.load %arg8[%c0_12, %c0_13, %c0_14] : memref<1x256x128xbf16, #tpu.memory_space<vmem>>, vector<1x256x128xbf16>
    %18 = vector.shape_cast %17 : vector<1x256x128xbf16> to vector<256x128xbf16>
    %19 = vector.shape_cast %16 : vector<256x128xbf16> to vector<1x256x128xbf16>
    tpu.vector_store %arg8[%c0_12, %c0_13, %c0_14], %19 {strides = array<i32>} : memref<1x256x128xbf16, #tpu.memory_space<vmem>>, vector<1x256x128xbf16>,
    %20 = arith.truncf %1 : vector<256x128xf32> to vector<256x128xbf16>
    %c0_15 = arith.constant 0 : index
    %c0_16 = arith.constant 0 : index
    %21 = vector.load %arg7[%c0_15, %c0_16] : memref<128x128xbf16, #tpu.memory_space<vmem>>, vector<128x128xbf16>
    %cst_17 = arith.constant dense<0.000000e+00> : vector<256x128xf32>
    %22 = tpu.matmul %20, %21, %cst_17 {dimension_numbers = #tpu.dot_dimension_numbers<[1], [0], [0], [1], [0, 0, 1, 1], [], []>} : vector<256x128xbf16>, vector<128x128xbf16>, vector<256x128xf32> -> vector<256x128xf32>
    %23 = arith.truncf %22 : vector<256x128xf32> to vector<256x128xbf16>
    %c0_18 = arith.constant 0 : index
    %c0_19 = arith.constant 0 : index
    %c0_20 = arith.constant 0 : index
    %24 = vector.load %arg9[%c0_18, %c0_19, %c0_20] : memref<1x256x128xbf16, #tpu.memory_space<vmem>>, vector<1x256x128xbf16>
    %25 = vector.shape_cast %24 : vector<1x256x128xbf16> to vector<256x128xbf16>
    %26 = vector.shape_cast %23 : vector<256x128xbf16> to vector<1x256x128xbf16>
    tpu.vector_store %arg9[%c0_18, %c0_19, %c0_20], %26 {strides = array<i32>} : memref<1x256x128xbf16, #tpu.memory_space<vmem>>, vector<1x256x128xbf16>,
    return
  }
  func.func @transform_0(%arg0: i32, %arg1: i32) -> (i32, i32, i32) {
    %c0_i32 = arith.constant 0 : i32
    %c0_i32_0 = arith.constant 0 : i32
    return %arg0, %arg1, %c0_i32 : i32, i32, i32
  }
  func.func @transform_1(%arg0: i32, %arg1: i32) -> (i32, i32, i32) {
    %c0_i32 = arith.constant 0 : i32
    %c0_i32_0 = arith.constant 0 : i32
    %c0_i32_1 = arith.constant 0 : i32
    return %arg0, %c0_i32, %c0_i32_0 : i32, i32, i32
  }
  func.func @transform_2(%arg0: i32, %arg1: i32) -> (i32, i32, i32) {
    %c0_i32 = arith.constant 0 : i32
    %c0_i32_0 = arith.constant 0 : i32
    %c0_i32_1 = arith.constant 0 : i32
    return %arg0, %c0_i32, %c0_i32_0 : i32, i32, i32
  }
  func.func @transform_3(%arg0: i32, %arg1: i32) -> (i32, i32) {
    %c0_i32 = arith.constant 0 : i32
    %c0_i32_0 = arith.constant 0 : i32
    %c0_i32_1 = arith.constant 0 : i32
    return %c0_i32, %c0_i32_0 : i32, i32
  }
  func.func @transform_4(%arg0: i32, %arg1: i32) -> (i32, i32) {
    %c0_i32 = arith.constant 0 : i32
    %c0_i32_0 = arith.constant 0 : i32
    %c0_i32_1 = arith.constant 0 : i32
    return %c0_i32, %c0_i32_0 : i32, i32
  }
  func.func @transform_5(%arg0: i32, %arg1: i32) -> (i32, i32) {
    %c0_i32 = arith.constant 0 : i32
    %c0_i32_0 = arith.constant 0 : i32
    %c0_i32_1 = arith.constant 0 : i32
    return %c0_i32, %c0_i32_0 : i32, i32
  }
  func.func @transform_6(%arg0: i32, %arg1: i32) -> (i32, i32, i32) {
    %c0_i32 = arith.constant 0 : i32
    %c0_i32_0 = arith.constant 0 : i32
    return %arg0, %arg1, %c0_i32 : i32, i32, i32
  }
  func.func @transform_7(%arg0: i32, %arg1: i32) -> (i32, i32, i32) {
    %c0_i32 = arith.constant 0 : i32
    %c0_i32_0 = arith.constant 0 : i32
    return %arg0, %arg1, %c0_i32 : i32, i32, i32
  }
}

</mosaic_0001>

<bundles_post_ra>
// kernel: tpu_custom_call.1
= control target key start
LH: loop header
LB: loop body
LE: loop exit
PB: predicated region body
PF: predicated region fallthrough
CT: control target
= control target key end

     0   :  { %s2359_s0 = inlined_call_operand.hbm [shape: f32[2,256,128], index: 0, kind: input, shape index: {}]   ;;  %s2360_s1 = inlined_call_operand.hbm [shape: f32[2,1,128], index: 1, kind: input, shape index: {}]   ;;  %s2361_s2 = inlined_call_operand.hbm [shape: f32[2,1,128], index: 2, kind: input, shape index: {}]   ;;  %s2362_s3 = inlined_call_operand.hbm [shape: bf16[128,128], index: 3, kind: input, shape index: {}]   ;;  %s2363_s4 = inlined_call_operand.vmem [shape: f32[1,128], index: 4, kind: input, shape index: {}]   ;;  %s2364_s5 = inlined_call_operand.hbm [shape: bf16[128,128], index: 5, kind: input, shape index: {}]   ;;  %s2365_s6 = inlined_call_operand.hbm [shape: bf16[2,256,128], index: 6, kind: output, shape index: {0}]   ;;  %s2366_s7 = inlined_call_operand.hbm [shape: bf16[2,256,128], index: 7, kind: output, shape index: {1}]  }
   0x1   :  { %2377 = sst [smem:[#allocation26_spill]] %s2360_s1 }
   0x2   :  { %2378 = sst [smem:[#allocation27_spill]] %s2362_s3 }
   0x3   :  { %2379 = sst [smem:[#allocation28_spill]] %s2364_s5 }
   0x4   :  { %13 = vsyncpa [#allocation3], 0 }
   0x5   :  { %15 = vsyncpa [#allocation3 + $0x1], 0 }
   0x6   :  { %16 = vsyncpa [#allocation6], 0 }
   0x7   :  { %18 = vsyncpa [#allocation6 + $0x1], 0 }
   0x8   :  { %19 = vsyncpa [#allocation9], 0 }
   0x9   :  { %20 = vsyncpa [#allocation4], 0 }
   0xa   :  { %22 = vsyncpa [#allocation4 + $0x1], 0 }
   0xb   :  { %23 = vsyncpa [#allocation13], 0 }
   0xc   :  { %25 = vsyncpa [#allocation13 + $0x1], 0  ;;  %s1967_s24 = smov 0   ;;  %s1969_s25 = smov 0  }
   0xd   :  { %s1971_s26 = smov 0   ;;  %s1973_s27 = smov 0  }
   0xe   :  { %s1975_s28 = smov 0   ;;  %s1977_s29 = smov 0  }
   0xf LB: > { %2380 = sst [smem:[#allocation19_spill]] %s1897_s24  ;;  %s1998_s30 = sadd.s32 4294967295, %s1917_s29   ;;  %s1917_s29 = sphi %s1977_s29, %s31_s29   ;;  %s1913_s28 = sphi %s1975_s28, %s2409_s28   ;;  %s1909_s27 = sphi %s1973_s27, %s2408_s27   ;;  %s1905_s26 = sphi %s1971_s26, %s2404_s26   ;;  %s1901_s25 = sphi %s1969_s25, %s2407_s25   ;;  %s1897_s24 = sphi %s1967_s24, %s2406_s24  }
  0x10   : > { %2381 = sst [smem:[#allocation20_spill]] %s1905_s26  ;;  %p1228_p0 = scmp.ge.s32.totalorder %s1917_s29, 1 }
  0x11   : > { %2382 = sst [smem:[#allocation21_spill]] %s1917_s29  ;;  %p66_p1 = scmp.eq.s32.totalorder %s1998_s30, 0 }
  0x12   : > { %p247_p2 = scmp.lt.s32.totalorder %s1917_s29, 3  ;;  %s2383_s3 = sld [smem:[#allocation27_spill]] }
  0x13   : > { %s1919_s12 = smov [#allocation8]   ;;  %s2367_s15 = smov 64  }
  0x14   : > { %p2006_p3 = pnand %p1228_p0, %p247_p2  ;;  %s260_s13 = sshll.u32 %s1919_s12, 4  ;;  %s261_s13 = int_to_ptr.vmem [resolvable:$true] %s260_s13 }
  0x15   : > { %s2368_s16 = smov 4   ;;  %s1227_s17 = sadd.s32 4294967294, %s1917_s29  }
  0x16   : > { %p1556_p4 = pneg %p2006_p3  ;;  %s43_s18 = sadd.s32 1, %s1913_s28 }
  0x17   : > { %s52_s19 = sadd.s32 1, %s1905_s26  ;;  %p45_p7 = scmp.ge.s32.totalorder %s43_s18, 2 }
  0x18   : > { %s258_s10 = sshll.u32 %s2383_s3, 4  ;;  %p2014_p5 = pnand %p1556_p4, %p66_p1  ;;  %s259_s10 = int_to_ptr.hbm [resolvable:$true] %s258_s10 }
  0x19   : > { %p59_p8 = scmp.ne.s32.totalorder %s1905_s26, %s1901_s25  ;;  %p60_p9 = scmp.eq.s32.totalorder %s1917_s29, 0 }
  0x1a   : > { %1559 = dma.hbm_to_vmem [thread:$0]  (!%p2014_p5), %s259_s10, 1024, %s261_s13, [#allocation9], %s2367_s15, %s2367_s15, %s2368_s16  }
  0x1b   : > { %p65_p10 = scmp.ne.s32.totalorder %s1901_s25, %s1897_s24  ;;  %s2411_s18 = smov (%p45_p7, %s43_s18), 0 }
  0x1c   : > { %2386 = sst [smem:[#allocation22_spill]] %s2411_s18  ;;  %p61_p11 = por %p60_p9, %p59_p8 }
  0x1d   : > { %p2036_p12 = por %p66_p1, %p65_p10  ;;  %s47_s21 = ssub.s32 %s1913_s28, %s2411_s18 }
  0x1e   : > { %p206_p13 = scmp.eq.s32.totalorder %s1998_s30, 1  ;;  %p50_p0 = scmp.eq.s32.totalorder %s47_s21, 0 }
  0x1f   : > { %p212_p2 = scmp.eq.s32.totalorder %s1227_s17, 1  ;;  %p1582_p6 = scmp.lt.s32.totalorder %s1917_s29, 2 }
  0x20   : > { %p2043_p4 = por %p206_p13, %p59_p8  ;;  %s2056_s9 = sand.u32 1, %s1905_s26  }
  0x21   : > { %s2049_s23 = scalar_select %p50_p0, %s1905_s26, %s52_s19  }
  0x22   : > { %s2388_s22 = scalar_select %p2043_p4, 1, 0 }
  0x23   : > { %2390 = sst [smem:[#allocation24_spill]] %s2049_s23  ;;  %p2051_p7 = por %p212_p2, %p65_p10 }
  0x24   : > { %2389 = sst [smem:[#allocation23_spill]] %s2388_s22  ;;  %p2058_p9 = pnand %p1582_p6, %p61_p11 }
  0x25   : > { %s2391_s8 = scalar_select %p2051_p7, 1, 0 }
  0x26   : > { %s315_s12 = sand.u32 1, %s1917_s29   ;;  %s2394_s1 = sld [smem:[#allocation26_spill]] }
  0x27   : > { %2392 = sst [smem:[#allocation25_spill]] %s2391_s8  ;;  %s318_s15 = scalar_lea.vmem [#allocation5], %s2056_s9 }
  0x28   : > { %s325_s16 = sshll.u32 %s318_s15, 4  ;;  %s316_s3 = scalar_lea.sflag [#allocation6], %s315_s12  ;;  %s326_s16 = int_to_ptr.vmem [resolvable:$true] %s325_s16 }
  0x29   : > { %s2395_s5 = sld [smem:[#allocation28_spill]]  ;;  %s1922_s29 = smov [#allocation10]  }
  0x2a   : > { %s277_s13 = sshll.u32 %s1922_s29, 4  ;;  %s2396_s17 = smov 4   ;;  %s278_s13 = int_to_ptr.vmem [resolvable:$true] %s277_s13 }
  0x2b   : > { %s1232_s15 = sshll.u32 %s2056_s9, 8  ;;  %s1313_s12 = sshll.u32 %s1913_s28, 8 }
  0x2c   : > { %s321_s19 = scalar_lea.hbm %s2394_s1, %s1913_s28  ;;  %s295_s23 = scalar_lea.vmem [#allocation2], %s1232_s15 }
  0x2d   : > { %s323_s21 = sshll.u32 %s321_s19, 4  ;;  %s2397_s19 = smov 64   ;;  %s324_s21 = int_to_ptr.hbm [resolvable:$true] %s323_s21 }
  0x2e   : > { %1569 = dma.hbm_to_vmem [thread:$0]  (!%p2058_p9), %s324_s21, 16, %s326_s16, %s316_s3  }
  0x2f   : > { %s275_s26 = sshll.u32 %s2395_s5, 4  ;;  %s302_s21 = scalar_lea.hbm %s2359_s0, %s1313_s12  ;;  %s276_s26 = int_to_ptr.hbm [resolvable:$true] %s275_s26 }
  0x30   : > { %1562 = dma.hbm_to_vmem [thread:$0]  (!%p2014_p5), %s276_s26, 1024, %s278_s13, [#allocation9], %s2397_s19, %s2397_s19, %s2396_s17  }
  0x31   : > { %s303_s18 = sshll.u32 %s302_s21, 4  ;;  %s305_s5 = sshll.u32 %s295_s23, 4  ;;  %s304_s18 = int_to_ptr.hbm [resolvable:$true] %s303_s18  ;;  %s306_s5 = int_to_ptr.vmem [resolvable:$true] %s305_s5 }
  0x32   : > { %s292_s29 = scalar_lea.sflag [#allocation3], %s2056_s9  ;;  %s1923_s8 = smov 128  }
  0x33   : > { %s1924_s14 = smov 8   ;;  %s338_s26 = scalar_lea.hbm %s2361_s2, %s1913_s28 }
  0x34   : > { %1566 = dma.hbm_to_vmem [thread:$0]  (!%p2058_p9), %s304_s18, 4096, %s306_s5, %s292_s29, %s1923_s8, %s1923_s8, %s1924_s14  }
  0x35   : > { %s340_s13 = sshll.u32 %s338_s26, 4  ;;  %s335_s17 = scalar_lea.vmem [#allocation7], %s2056_s9  ;;  %s341_s13 = int_to_ptr.hbm [resolvable:$true] %s340_s13 }
  0x36   : > { %s342_s19 = sshll.u32 %s335_s17, 4  ;;  %351 = sbr.rel (%p2006_p3) target bundleno = 369 (0x171), region = 44  ;;  %s343_s19 = int_to_ptr.vmem [resolvable:$true] %s342_s19 }
  0x37   : > { %1572 = dma.hbm_to_vmem [thread:$0]  (!%p2058_p9), %s341_s13, 16, %s343_s19, %s316_s3  }
  0x38   : > { %s2096_s1 = sand.u32 (!%p2006_p3), 1, %s1901_s25  }
  0x39   : > { %s1236_s5 = sshll.u32 (!%p2006_p3), %s2096_s1, 8  ;;  %s354_s8 = scalar_lea.sflag (!%p2006_p3), [#allocation3], %s2096_s1 }
  0x3a   : > { %s2100_s24 = scalar_lea.vmem (!%p2006_p3), [#allocation2], %s1236_s5 }
  0x3b   : > { %1876 = dma.done.wait (%p2036_p12), %s354_s8, 4096  }
  0x3c   : > { %1878 = vsyncadd (%p2036_p12), %s354_s8, 4294963200  ;;  %s363_s3 = sand.u32 1, %s1998_s30   ;;  %s366_s22 = scalar_lea.vmem [#allocation5], %s2096_s1 }
  0x3d   : > { %s364_s11 = scalar_lea.sflag [#allocation6], %s363_s3 }
  0x3e   : > { %1880 = dma.done.wait (%p2036_p12), %s364_s11, 32  }
  0x3f   : > { %1882 = vsyncadd (%p2036_p12), %s364_s11, 4294967264  ;;  %s375_s9 = scalar_lea.vmem [#allocation7], %s2096_s1 }
  0x40   : > { %1884 = dma.done.wait (%p66_p1), [#allocation9], 2048  }
  0x41   : > { %1886 = vsyncadd (%p66_p1), [#allocation9], 4294965248  ;;  %v1321_v0 = vld [vmem:[#allocation8 + $0x38] sm:$0xff]  ;;  %v1320_v2 = vld [vmem:[#allocation8 + $0x30] sm:$0xff]  ;;  %s1239_s10 = sshll.u32 %s2096_s1, 7  ;;  %s1330_s16 = sshll.u32 %s1909_s27, 7 }
  0x42   : > { %v1329_v1 = vld [vmem:[#allocation10 + $0x38] sm:$0xff]  ;;  %621 = vmatpush.bf16.msra.mxu0 %v1321_v0  ;;  %1522 = vmatpush.bf16.msra.mxu2 %v1321_v0  ;;  %v1328_v3 = vld [vmem:[#allocation10 + $0x30] sm:$0xff]  ;;  %v1319_v4 = vld [vmem:[#allocation8 + $0x28] sm:$0xff]  ;;  %s2229_s15 = scalar_lea.vmem [#allocation12], %s1239_s10  ;;  %s2232_s12 = scalar_lea.vmem [#allocation11], %s1239_s10 }
  0x43   : > { %854 = vmatpush.bf16.msra.mxu1 %v1329_v1  ;;  %1530 = vmatpush.bf16.msra.mxu3 %v1329_v1  ;;  %v1327_v5 = vld [vmem:[#allocation10 + $0x28] sm:$0xff]  ;;  %v1318_v6 = vld [vmem:[#allocation8 + $0x20] sm:$0xff]  ;;  %v1317_v8 = vld [vmem:[#allocation8 + $0x18] sm:$0xff]  ;;  %s1026_s23 = scalar_lea.hbm %s2365_s6, %s1330_s16  ;;  %s1027_s29 = sshll.u32 %s2232_s12, 4  ;;  %s2299_s29 = int_to_ptr.vmem [resolvable:$true] %s1027_s29 }
  0x44   : > { %v1326_v7 = vld [vmem:[#allocation10 + $0x20] sm:$0xff]  ;;  %v1325_v9 = vld [vmem:[#allocation10 + $0x18] sm:$0xff]  ;;  %v1316_v10 = vld [vmem:[#allocation8 + $0x10] sm:$0xff]  ;;  %s1045_s27 = scalar_lea.hbm %s2366_s7, %s1330_s16  ;;  %s1029_s13 = sshll.u32 %s1026_s23, 4  ;;  %s1030_s13 = int_to_ptr.hbm [resolvable:$true] %s1029_s13 }
  0x45   : > { %v433_v11 = vld [vmem:[%s2100_s24] sm:$0xff]  ;;  %v434_v13 = vld [vmem:[%s2100_s24 + $0x8] sm:$0xff]  ;;  %v1324_v16 = vld [vmem:[#allocation10 + $0x10] sm:$0xff]  ;;  %s1046_s19 = sshll.u32 %s2229_s15, 4  ;;  %s1048_s5 = sshll.u32 %s1045_s27, 4  ;;  %s2305_s19 = int_to_ptr.vmem [resolvable:$true] %s1046_s19  ;;  %s2307_s5 = int_to_ptr.hbm [resolvable:$true] %s1048_s5 }
  0x46   : > { %622 = vmatpush.bf16.msra.mxu0 %v1320_v2  ;;  %1523 = vmatpush.bf16.msra.mxu2 %v1320_v2  ;;  %v2120_v12 = vld [vmem:[%s366_s22] ss:$0 sm:$0xff]  ;;  %v450_v15 = vld [vmem:[%s2100_s24 + $0x88] sm:$0xff]  ;;  %v774_v32 = vpack.c.bf16 %v434_v13, %v433_v11  ;;  %v435_v34 = vld [vmem:[%s2100_s24 + $0x10] sm:$0xff]  ;;  %s1008_s8 = scalar_lea.sflag [#allocation4], %s2096_s1 }
  0x47   : > { %855 = vmatpush.bf16.msra.mxu1 %v1328_v3  ;;  %1531 = vmatpush.bf16.msra.mxu3 %v1328_v3  ;;  %v449_v14 = vld [vmem:[%s2100_s24 + $0x80] sm:$0xff]  ;;  %v469_v17 = vsub.f32 %v433_v11, %v2120_v12  ;;  %v470_v18 = vsub.f32 %v434_v13, %v2120_v12  ;;  %v486_v21 = vsub.f32 %v450_v15, %v2120_v12  ;;  %v1315_v22 = vld [vmem:[#allocation8 + $0x8] sm:$0xff]  ;;  %v436_v35 = vld [vmem:[%s2100_s24 + $0x18] sm:$0xff] }
  0x48   : > { %v2129_v19 = vld [vmem:[%s375_s9] ss:$0 sm:$0xff]  ;;  %v485_v20 = vsub.f32 %v449_v14, %v2120_v12  ;;  %v1323_v23 = vld [vmem:[#allocation10 + $0x8] sm:$0xff]  ;;  %v1314_v28 = vld [vmem:[#allocation8] sm:$0xff]  ;;  %v782_v33 = vpack.c.bf16 %v450_v15, %v449_v14  ;;  %v471_v38 = vsub.f32 %v435_v34, %v2120_v12  ;;  %v472_v39 = vsub.f32 %v436_v35, %v2120_v12  ;;  %s1815_s9 = scalar_lea.hbm %s2365_s6, 256 }
  0x49   : > { %v505_v24 = vmul.f32 %v2129_v19, %v469_v17  ;;  %v506_v25 = vmul.f32 %v2129_v19, %v470_v18  ;;  %v522_v27 = vmul.f32 %v2129_v19, %v486_v21  ;;  %v1322_v29 = vld [vmem:[#allocation10] sm:$0xff]  ;;  %v451_v36 = vld [vmem:[%s2100_s24 + $0x90] sm:$0xff]  ;;  %v452_v37 = vld [vmem:[%s2100_s24 + $0x98] sm:$0xff]  ;;  %v775_v48 = vpack.c.bf16 %v436_v35, %v435_v34 }
  0x4a   : > { %623 = vmatpush.bf16.msra.mxu0 %v1319_v4  ;;  %1524 = vmatpush.bf16.msra.mxu2 %v1319_v4  ;;  %v521_v26 = vmul.f32 %v2129_v19, %v485_v20  ;;  %v487_v40 = vsub.f32 %v451_v36, %v2120_v12  ;;  %v488_v41 = vsub.f32 %v452_v37, %v2120_v12  ;;  %v437_v50 = vld [vmem:[%s2100_s24 + $0x20] sm:$0xff]  ;;  %v438_v51 = vld [vmem:[%s2100_s24 + $0x28] sm:$0xff]  ;;  %v439_v2 = vld [vmem:[%s2100_s24 + $0x30] sm:$0xff] }
  0x4b   : > { %856 = vmatpush.bf16.msra.mxu1 %v1327_v5  ;;  %1532 = vmatpush.bf16.msra.mxu3 %v1327_v5  ;;  %v537_v30 = vpack.c.bf16 %v506_v25, %v505_v24  ;;  %v507_v42 = vmul.f32 %v2129_v19, %v471_v38  ;;  %v508_v43 = vmul.f32 %v2129_v19, %v472_v39  ;;  %v453_v52 = vld [vmem:[%s2100_s24 + $0xa0] sm:$0xff]  ;;  %v454_v53 = vld [vmem:[%s2100_s24 + $0xa8] sm:$0xff]  ;;  %v440_v3 = vld [vmem:[%s2100_s24 + $0x38] sm:$0xff] }
  0x4c   : > { %v545_v31 = vpack.c.bf16 %v522_v27, %v521_v26  ;;  %v523_v44 = vmul.f32 %v2129_v19, %v487_v40  ;;  %v524_v45 = vmul.f32 %v2129_v19, %v488_v41  ;;  %v783_v49 = vpack.c.bf16 %v452_v37, %v451_v36  ;;  %v455_v4 = vld [vmem:[%s2100_s24 + $0xb0] sm:$0xff]  ;;  %v456_v5 = vld [vmem:[%s2100_s24 + $0xb8] sm:$0xff]  ;;  %v441_v20 = vld [vmem:[%s2100_s24 + $0x40] sm:$0xff] }
  0x4d   : > { %v538_v46 = vpack.c.bf16 %v508_v43, %v507_v42  ;;  %v473_v54 = vsub.f32 %v437_v50, %v2120_v12  ;;  %v474_v55 = vsub.f32 %v438_v51, %v2120_v12  ;;  %v489_v56 = vsub.f32 %v453_v52, %v2120_v12  ;;  %v442_v21 = vld [vmem:[%s2100_s24 + $0x48] sm:$0xff]  ;;  %v443_v36 = vld [vmem:[%s2100_s24 + $0x50] sm:$0xff]  ;;  %v444_v37 = vld [vmem:[%s2100_s24 + $0x58] sm:$0xff] }
  0x4e   : > { %624 = vmatpush.bf16.msra.mxu0 %v1318_v6  ;;  %1525 = vmatpush.bf16.msra.mxu2 %v1318_v6  ;;  %v546_v47 = vpack.c.bf16 %v524_v45, %v523_v44  ;;  %v490_v57 = vsub.f32 %v454_v53, %v2120_v12  ;;  %v776_v0 = vpack.c.bf16 %v438_v51, %v437_v50  ;;  %v459_v38 = vld [vmem:[%s2100_s24 + $0xd0] sm:$0xff]  ;;  %v460_v39 = vld [vmem:[%s2100_s24 + $0xd8] sm:$0xff] }
  0x4f   : > { %857 = vmatpush.bf16.msra.mxu1 %v1326_v7  ;;  %1533 = vmatpush.bf16.msra.mxu3 %v1326_v7  ;;  %v509_v58 = vmul.f32 %v2129_v19, %v473_v54  ;;  %v510_v59 = vmul.f32 %v2129_v19, %v474_v55  ;;  %v525_v60 = vmul.f32 %v2129_v19, %v489_v56  ;;  %v461_v54 = vld [vmem:[%s2100_s24 + $0xe0] sm:$0xff]  ;;  %v462_v55 = vld [vmem:[%s2100_s24 + $0xe8] sm:$0xff] }
  0x50   : > { %v526_v61 = vmul.f32 %v2129_v19, %v490_v57  ;;  %v784_v1 = vpack.c.bf16 %v454_v53, %v453_v52  ;;  %v475_v6 = vsub.f32 %v439_v2, %v2120_v12  ;;  %v476_v7 = vsub.f32 %v440_v3, %v2120_v12  ;;  %v445_v52 = vld [vmem:[%s2100_s24 + $0x60] sm:$0xff]  ;;  %v446_v53 = vld [vmem:[%s2100_s24 + $0x68] sm:$0xff] }
  0x51   : > { %v539_v62 = vpack.c.bf16 %v510_v59, %v509_v58  ;;  %v777_v17 = vpack.c.bf16 %v440_v3, %v439_v2  ;;  %v785_v18 = vpack.c.bf16 %v456_v5, %v455_v4  ;;  %v477_v24 = vsub.f32 %v441_v20, %v2120_v12 }
  0x52   : > { %625 = vmatpush.bf16.msra.mxu0 %v1317_v8  ;;  %1526 = vmatpush.bf16.msra.mxu2 %v1317_v8  ;;  %v547_v63 = vpack.c.bf16 %v526_v61, %v525_v60  ;;  %v491_v8 = vsub.f32 %v455_v4, %v2120_v12  ;;  %v512_v11 = vmul.f32 %v2129_v19, %v476_v7  ;;  %v447_v4 = vld [vmem:[%s2100_s24 + $0x70] sm:$0xff]  ;;  %v464_v7 = vld [vmem:[%s2100_s24 + $0xf8] sm:$0xff] }
  0x53   : > { %858 = vmatpush.bf16.msra.mxu1 %v1325_v9  ;;  %1534 = vmatpush.bf16.msra.mxu3 %v1325_v9  ;;  %v492_v9 = vsub.f32 %v456_v5, %v2120_v12  ;;  %v478_v25 = vsub.f32 %v442_v21, %v2120_v12  ;;  %v778_v34 = vpack.c.bf16 %v442_v21, %v441_v20  ;;  %v448_v5 = vld [vmem:[%s2100_s24 + $0x78] sm:$0xff] }
  0x54   : > { %v527_v13 = vmul.f32 %v2129_v19, %v491_v8  ;;  %v479_v40 = vsub.f32 %v443_v36, %v2120_v12  ;;  %v480_v41 = vsub.f32 %v444_v37, %v2120_v12  ;;  %v495_v42 = vsub.f32 %v459_v38, %v2120_v12 }
  0x55   : > { %v528_v14 = vmul.f32 %v2129_v19, %v492_v9  ;;  %v496_v43 = vsub.f32 %v460_v39, %v2120_v12  ;;  %v779_v50 = vpack.c.bf16 %v444_v37, %v443_v36  ;;  %v787_v51 = vpack.c.bf16 %v460_v39, %v459_v38 }
  0x56   : > { %626 = vmatpush.bf16.msra.mxu0 %v1316_v10  ;;  %1527 = vmatpush.bf16.msra.mxu2 %v1316_v10  ;;  %v511_v10 = vmul.f32 %v2129_v19, %v475_v6  ;;  %v515_v44 = vmul.f32 %v2129_v19, %v479_v40  ;;  %v516_v45 = vmul.f32 %v2129_v19, %v480_v41  ;;  %v463_v6 = vld [vmem:[%s2100_s24 + $0xf0] sm:$0xff] }
  0x57   : > { %859 = vmatpush.bf16.msra.mxu1 %v1324_v16  ;;  %1535 = vmatpush.bf16.msra.mxu3 %v1324_v16  ;;  %v548_v16 = vpack.c.bf16 %v528_v14, %v527_v13  ;;  %v481_v56 = vsub.f32 %v445_v52, %v2120_v12  ;;  %v482_v57 = vsub.f32 %v446_v53, %v2120_v12 }
  0x58   : > { %v540_v15 = vpack.c.bf16 %v512_v11, %v511_v10  ;;  %v497_v58 = vsub.f32 %v461_v54, %v2120_v12  ;;  %v498_v59 = vsub.f32 %v462_v55, %v2120_v12  ;;  %v780_v2 = vpack.c.bf16 %v446_v53, %v445_v52 }
  0x59   : > { %v517_v60 = vmul.f32 %v2129_v19, %v481_v56  ;;  %v518_v61 = vmul.f32 %v2129_v19, %v482_v57  ;;  %v788_v3 = vpack.c.bf16 %v462_v55, %v461_v54  ;;  %v483_v8 = vsub.f32 %v447_v4, %v2120_v12 }
  0x5a   : > { %627 = vmatpush.bf16.msra.mxu0 %v1315_v22  ;;  %1528 = vmatpush.bf16.msra.mxu2 %v1315_v22  ;;  %v457_v22 = vld [vmem:[%s2100_s24 + $0xc0] sm:$0xff]  ;;  %v484_v9 = vsub.f32 %v448_v5, %v2120_v12  ;;  %v499_v10 = vsub.f32 %v463_v6, %v2120_v12  ;;  %v500_v11 = vsub.f32 %v464_v7, %v2120_v12 }
  0x5b   : > { %860 = vmatpush.bf16.msra.mxu1 %v1323_v23  ;;  %1536 = vmatpush.bf16.msra.mxu3 %v1323_v23  ;;  %v458_v23 = vld [vmem:[%s2100_s24 + $0xc8] sm:$0xff]  ;;  %v493_v26 = vsub.f32 %v457_v22, %v2120_v12  ;;  %v519_v13 = vmul.f32 %v2129_v19, %v483_v8  ;;  %v781_v20 = vpack.c.bf16 %v448_v5, %v447_v4  ;;  %s1809_s24 = sshra.s32 %s1030_s13, 4  ;;  %s1810_s24 = int_to_ptr.hbm [resolvable:$true] %s1809_s24 }
  0x5c   : > { %v494_v27 = vsub.f32 %v458_v23, %v2120_v12  ;;  %v786_v35 = vpack.c.bf16 %v458_v23, %v457_v22  ;;  %v520_v14 = vmul.f32 %v2129_v19, %v484_v9  ;;  %v789_v21 = vpack.c.bf16 %v464_v7, %v463_v6  ;;  %v2224_v12 = vld [vmem:[%s2363_s4] ss:$0 sm:$0xff]  ;;  %s1811_s3 = scalar_lea.hbm %s1810_s24, 128  ;;  %p1816_p6 = scmp.lt.s32.totalorder %s1810_s24, %s2365_s6 }
  0x5d   : > { %p1812_p1 = scmp.ne.s32.totalorder %s1810_s24, %s1811_s3  ;;  %p1817_p8 = scmp.lt.s32.totalorder %s1815_s9, %s1811_s3 }
  0x5e   : > { %628 = vmatpush.bf16.msra.mxu0 %v1314_v28  ;;  %1529 = vmatpush.bf16.msra.mxu2 %v1314_v28  ;;  %v513_v28 = vmul.f32 %v2129_v19, %v477_v24 }
  0x5f   : > { %861 = vmatpush.bf16.msra.mxu1 %v1322_v29  ;;  %1537 = vmatpush.bf16.msra.mxu3 %v1322_v29  ;;  %v514_v29 = vmul.f32 %v2129_v19, %v478_v25  ;;  %p1813_p3 = pnand %p1812_p1, %p2043_p4  ;;  %p1818_p10 = por %p1817_p8, %p1816_p6 }
  0x61   : > { %629 = vmatmul.bf16.vlgmr.msra.gmra.mxu0 %v537_v30  ;;  %669 = vmatmul.bf16.vlgmr.msra.gmra.mxu2 %v545_v31  ;;  %v529_v30 = vmul.f32 %v2129_v19, %v493_v26  ;;  %v530_v31 = vmul.f32 %v2129_v19, %v494_v27  ;;  %p1814_p5 = pneg %p1813_p3 }
  0x62   : > { %862 = vmatmul.bf16.vlgmr.msra.gmra.mxu1 %v774_v32  ;;  %902 = vmatmul.bf16.vlgmr.msra.gmra.mxu3 %v782_v33  ;;  %v541_v32 = vpack.c.bf16 %v514_v29, %v513_v28 }
  0x63   : > { %v549_v33 = vpack.c.bf16 %v530_v31, %v529_v30  ;;  %p1819_p11 = pnand %p1818_p10, %p1814_p5 }
  0x71   : > { %634 = vmatmul.bf16.gmra.mxu0 %v538_v46  ;;  %674 = vmatmul.bf16.gmra.mxu2 %v546_v47  ;;  %v531_v46 = vmul.f32 %v2129_v19, %v495_v42  ;;  %v532_v47 = vmul.f32 %v2129_v19, %v496_v43 }
  0x72   : > { %867 = vmatmul.bf16.gmra.mxu1 %v775_v48  ;;  %907 = vmatmul.bf16.gmra.mxu3 %v783_v49  ;;  %v542_v48 = vpack.c.bf16 %v516_v45, %v515_v44 }
  0x73   : > { %v550_v49 = vpack.c.bf16 %v532_v47, %v531_v46 }
  0x81   : > { %639 = vmatmul.bf16.gmra.mxu0 %v539_v62  ;;  %679 = vmatmul.bf16.gmra.mxu2 %v547_v63  ;;  %v533_v62 = vmul.f32 %v2129_v19, %v497_v58  ;;  %v534_v63 = vmul.f32 %v2129_v19, %v498_v59 }
  0x82   : > { %872 = vmatmul.bf16.gmra.mxu1 %v776_v0  ;;  %912 = vmatmul.bf16.gmra.mxu3 %v784_v1  ;;  %v543_v0 = vpack.c.bf16 %v518_v61, %v517_v60 }
  0x83   : > { %v551_v1 = vpack.c.bf16 %v534_v63, %v533_v62 }
  0x91   : > { %644 = vmatmul.bf16.gmra.mxu0 %v540_v15  ;;  %684 = vmatmul.bf16.gmra.mxu2 %v548_v16  ;;  %v535_v15 = vmul.f32 %v2129_v19, %v499_v10  ;;  %v536_v16 = vmul.f32 %v2129_v19, %v500_v11 }
  0x92   : > { %877 = vmatmul.bf16.gmra.mxu1 %v777_v17  ;;  %917 = vmatmul.bf16.gmra.mxu3 %v785_v18  ;;  %v544_v17 = vpack.c.bf16 %v520_v14, %v519_v13 }
  0x93   : > { %v552_v18 = vpack.c.bf16 %v536_v16, %v535_v15 }
  0xa1   : > { %649 = vmatmul.bf16.gmra.mxu0 %v541_v32  ;;  %689 = vmatmul.bf16.gmra.mxu2 %v549_v33 }
  0xa2   : > { %882 = vmatmul.bf16.gmra.mxu1 %v778_v34  ;;  %922 = vmatmul.bf16.gmra.mxu3 %v786_v35 }
  0xb1   : > { %654 = vmatmul.bf16.gmra.mxu0 %v542_v48  ;;  %694 = vmatmul.bf16.gmra.mxu2 %v550_v49 }
  0xb2   : > { %887 = vmatmul.bf16.gmra.mxu1 %v779_v50  ;;  %927 = vmatmul.bf16.gmra.mxu3 %v787_v51 }
  0xc1   : > { %659 = vmatmul.bf16.gmra.mxu0 %v543_v0  ;;  %699 = vmatmul.bf16.gmra.mxu2 %v551_v1 }
  0xc2   : > { %892 = vmatmul.bf16.gmra.mxu1 %v780_v2  ;;  %932 = vmatmul.bf16.gmra.mxu3 %v788_v3 }
  0xd1   : > { %664 = vmatmul.bf16.gmra.mxu0 %v544_v17  ;;  %704 = vmatmul.bf16.gmra.mxu2 %v552_v18 }
  0xd2   : > { %897 = vmatmul.bf16.gmra.mxu1 %v781_v20  ;;  %937 = vmatmul.bf16.gmra.mxu3 %v789_v21 }
  0xde   : > { %v630_v22 = vpop.f32.mrf.mxu0 }
  0xdf   : > { %v863_v23 = vpop.f32.mrf.mxu1  ;;  %v631_v19 = vadd.f32 %v2224_v12, %v630_v22 }
  0xe4   : > { %v670_v24 = vpop.f32.mrf.mxu2 }
  0xe5   : > { %v903_v25 = vpop.f32.mrf.mxu3  ;;  %v671_v32 = vadd.f32 %v2224_v12, %v670_v24 }
  0xe6   : > { %v632_v26 = vpop.f32.mrf.mxu0 }
  0xe7   : > { %v633_v27 = vadd.f32 %v2224_v12, %v632_v26  ;;  %v865_v28 = vpop.f32.mrf.mxu1 }
  0xe8   : > { %v1415_v29 = vpack.c.bf16 %v865_v28, %v863_v23 }
  0xe9   : > { %v1335_v30 = vpack.c.bf16 %v633_v27, %v631_v19 }
  0xea   : > { %1416 = vst [vmem:[%s2229_s15] sm:$0xff] %v1415_v29  }
  0xeb   : > { %1336 = vst [vmem:[%s2232_s12] sm:$0xff] %v1335_v30  }
  0xec   : > { %v672_v31 = vpop.f32.mrf.mxu2 }
  0xed   : > { %v673_v33 = vadd.f32 %v2224_v12, %v672_v31  ;;  %v905_v34 = vpop.f32.mrf.mxu3 }
  0xee   : > { %v1455_v35 = vpack.c.bf16 %v905_v34, %v903_v25  ;;  %v635_v36 = vpop.f32.mrf.mxu0 }
  0xef   : > { %v1375_v37 = vpack.c.bf16 %v673_v33, %v671_v32  ;;  %v868_v38 = vpop.f32.mrf.mxu1  ;;  %v636_v42 = vadd.f32 %v2224_v12, %v635_v36 }
  0xf0   : > { %1514 = vst [vmem:[%s2229_s15 + $0x40] sm:$0xff] %v1455_v35  }
  0xf1   : > { %1499 = vst [vmem:[%s2232_s12 + $0x40] sm:$0xff] %v1375_v37  }
  0xf4   : > { %v675_v39 = vpop.f32.mrf.mxu2 }
  0xf5   : > { %v908_v40 = vpop.f32.mrf.mxu3  ;;  %v676_v48 = vadd.f32 %v2224_v12, %v675_v39 }
  0xf6   : > { %v637_v41 = vpop.f32.mrf.mxu0 }
  0xf7   : > { %v638_v43 = vadd.f32 %v2224_v12, %v637_v41  ;;  %v870_v44 = vpop.f32.mrf.mxu1 }
  0xf8   : > { %v1420_v45 = vpack.c.bf16 %v870_v44, %v868_v38 }
  0xf9   : > { %v1340_v46 = vpack.c.bf16 %v638_v43, %v636_v42 }
  0xfa   : > { %1507 = vst [vmem:[%s2229_s15 + $0x8] sm:$0xff] %v1420_v45  }
  0xfb   : > { %1492 = vst [vmem:[%s2232_s12 + $0x8] sm:$0xff] %v1340_v46  }
  0xfc   : > { %v677_v47 = vpop.f32.mrf.mxu2 }
  0xfd   : > { %v678_v49 = vadd.f32 %v2224_v12, %v677_v47  ;;  %v910_v50 = vpop.f32.mrf.mxu3 }
  0xfe   : > { %v1460_v51 = vpack.c.bf16 %v910_v50, %v908_v40  ;;  %v640_v52 = vpop.f32.mrf.mxu0 }
  0xff   : > { %v1380_v53 = vpack.c.bf16 %v678_v49, %v676_v48  ;;  %v873_v54 = vpop.f32.mrf.mxu1  ;;  %v641_v58 = vadd.f32 %v2224_v12, %v640_v52 }
 0x100   : > { %1515 = vst [vmem:[%s2229_s15 + $0x48] sm:$0xff] %v1460_v51  }
 0x101   : > { %1500 = vst [vmem:[%s2232_s12 + $0x48] sm:$0xff] %v1380_v53  }
 0x104   : > { %v680_v55 = vpop.f32.mrf.mxu2 }
 0x105   : > { %v913_v56 = vpop.f32.mrf.mxu3  ;;  %v681_v0 = vadd.f32 %v2224_v12, %v680_v55 }
 0x106   : > { %v642_v57 = vpop.f32.mrf.mxu0 }
 0x107   : > { %v643_v59 = vadd.f32 %v2224_v12, %v642_v57  ;;  %v875_v60 = vpop.f32.mrf.mxu1 }
 0x108   : > { %v1425_v61 = vpack.c.bf16 %v875_v60, %v873_v54 }
 0x109   : > { %v1345_v62 = vpack.c.bf16 %v643_v59, %v641_v58 }
 0x10a   : > { %1508 = vst [vmem:[%s2229_s15 + $0x10] sm:$0xff] %v1425_v61  }
 0x10b   : > { %1493 = vst [vmem:[%s2232_s12 + $0x10] sm:$0xff] %v1345_v62  }
 0x10c   : > { %v682_v63 = vpop.f32.mrf.mxu2 }
 0x10d   : > { %v683_v1 = vadd.f32 %v2224_v12, %v682_v63  ;;  %v915_v2 = vpop.f32.mrf.mxu3 }
 0x10e   : > { %v1465_v3 = vpack.c.bf16 %v915_v2, %v913_v56  ;;  %v645_v4 = vpop.f32.mrf.mxu0 }
 0x10f   : > { %v1385_v5 = vpack.c.bf16 %v683_v1, %v681_v0  ;;  %v878_v6 = vpop.f32.mrf.mxu1  ;;  %v646_v10 = vadd.f32 %v2224_v12, %v645_v4 }
 0x110   : > { %1516 = vst [vmem:[%s2229_s15 + $0x50] sm:$0xff] %v1465_v3  }
 0x111   : > { %1501 = vst [vmem:[%s2232_s12 + $0x50] sm:$0xff] %v1385_v5  }
 0x114   : > { %v685_v7 = vpop.f32.mrf.mxu2 }
 0x115   : > { %v918_v8 = vpop.f32.mrf.mxu3  ;;  %v686_v17 = vadd.f32 %v2224_v12, %v685_v7 }
 0x116   : > { %v647_v9 = vpop.f32.mrf.mxu0 }
 0x117   : > { %v648_v11 = vadd.f32 %v2224_v12, %v647_v9  ;;  %v880_v13 = vpop.f32.mrf.mxu1 }
 0x118   : > { %v1430_v14 = vpack.c.bf16 %v880_v13, %v878_v6 }
 0x119   : > { %v1350_v15 = vpack.c.bf16 %v648_v11, %v646_v10 }
 0x11a   : > { %1509 = vst [vmem:[%s2229_s15 + $0x18] sm:$0xff] %v1430_v14  }
 0x11b   : > { %1494 = vst [vmem:[%s2232_s12 + $0x18] sm:$0xff] %v1350_v15  }
 0x11c   : > { %v687_v16 = vpop.f32.mrf.mxu2 }
 0x11d   : > { %v688_v18 = vadd.f32 %v2224_v12, %v687_v16  ;;  %v920_v20 = vpop.f32.mrf.mxu3 }
 0x11e   : > { %v1470_v21 = vpack.c.bf16 %v920_v20, %v918_v8  ;;  %v650_v22 = vpop.f32.mrf.mxu0 }
 0x11f   : > { %v1390_v23 = vpack.c.bf16 %v688_v18, %v686_v17  ;;  %v883_v24 = vpop.f32.mrf.mxu1  ;;  %v651_v27 = vadd.f32 %v2224_v12, %v650_v22 }
 0x120   : > { %1517 = vst [vmem:[%s2229_s15 + $0x58] sm:$0xff] %v1470_v21  }
 0x121   : > { %1502 = vst [vmem:[%s2232_s12 + $0x58] sm:$0xff] %v1390_v23  }
 0x124   : > { %v690_v25 = vpop.f32.mrf.mxu2 }
 0x125   : > { %v923_v26 = vpop.f32.mrf.mxu3  ;;  %v691_v33 = vadd.f32 %v2224_v12, %v690_v25 }
 0x126   : > { %v652_v19 = vpop.f32.mrf.mxu0 }
 0x127   : > { %v653_v28 = vadd.f32 %v2224_v12, %v652_v19  ;;  %v885_v29 = vpop.f32.mrf.mxu1 }
 0x128   : > { %v1435_v30 = vpack.c.bf16 %v885_v29, %v883_v24 }
 0x129   : > { %v1355_v31 = vpack.c.bf16 %v653_v28, %v651_v27 }
 0x12a   : > { %1510 = vst [vmem:[%s2229_s15 + $0x20] sm:$0xff] %v1435_v30  }
 0x12b   : > { %1495 = vst [vmem:[%s2232_s12 + $0x20] sm:$0xff] %v1355_v31  }
 0x12c   : > { %v692_v32 = vpop.f32.mrf.mxu2 }
 0x12d   : > { %v693_v34 = vadd.f32 %v2224_v12, %v692_v32  ;;  %v925_v35 = vpop.f32.mrf.mxu3 }
 0x12e   : > { %v1475_v36 = vpack.c.bf16 %v925_v35, %v923_v26  ;;  %v655_v37 = vpop.f32.mrf.mxu0 }
 0x12f   : > { %v1395_v38 = vpack.c.bf16 %v693_v34, %v691_v33  ;;  %v888_v39 = vpop.f32.mrf.mxu1  ;;  %v656_v43 = vadd.f32 %v2224_v12, %v655_v37 }
 0x130   : > { %1518 = vst [vmem:[%s2229_s15 + $0x60] sm:$0xff] %v1475_v36  }
 0x131   : > { %1503 = vst [vmem:[%s2232_s12 + $0x60] sm:$0xff] %v1395_v38  }
 0x134   : > { %v695_v40 = vpop.f32.mrf.mxu2 }
 0x135   : > { %v928_v41 = vpop.f32.mrf.mxu3  ;;  %v696_v49 = vadd.f32 %v2224_v12, %v695_v40 }
 0x136   : > { %v657_v42 = vpop.f32.mrf.mxu0 }
 0x137   : > { %v658_v44 = vadd.f32 %v2224_v12, %v657_v42  ;;  %v890_v45 = vpop.f32.mrf.mxu1 }
 0x138   : > { %v1440_v46 = vpack.c.bf16 %v890_v45, %v888_v39 }
 0x139   : > { %v1360_v47 = vpack.c.bf16 %v658_v44, %v656_v43 }
 0x13a   : > { %1511 = vst [vmem:[%s2229_s15 + $0x28] sm:$0xff] %v1440_v46  }
 0x13b   : > { %1496 = vst [vmem:[%s2232_s12 + $0x28] sm:$0xff] %v1360_v47  }
 0x13c   : > { %v697_v48 = vpop.f32.mrf.mxu2 }
 0x13d   : > { %v698_v50 = vadd.f32 %v2224_v12, %v697_v48  ;;  %v930_v51 = vpop.f32.mrf.mxu3 }
 0x13e   : > { %v1480_v52 = vpack.c.bf16 %v930_v51, %v928_v41  ;;  %v660_v53 = vpop.f32.mrf.mxu0 }
 0x13f   : > { %v1400_v54 = vpack.c.bf16 %v698_v50, %v696_v49  ;;  %v893_v55 = vpop.f32.mrf.mxu1  ;;  %v661_v59 = vadd.f32 %v2224_v12, %v660_v53 }
 0x140   : > { %1519 = vst [vmem:[%s2229_s15 + $0x68] sm:$0xff] %v1480_v52  }
 0x141   : > { %1504 = vst [vmem:[%s2232_s12 + $0x68] sm:$0xff] %v1400_v54  }
 0x144   : > { %v700_v56 = vpop.f32.mrf.mxu2 }
 0x145   : > { %v933_v57 = vpop.f32.mrf.mxu3  ;;  %v701_v1 = vadd.f32 %v2224_v12, %v700_v56 }
 0x146   : > { %v662_v58 = vpop.f32.mrf.mxu0 }
 0x147   : > { %v663_v60 = vadd.f32 %v2224_v12, %v662_v58  ;;  %v895_v61 = vpop.f32.mrf.mxu1 }
 0x148   : > { %v1445_v62 = vpack.c.bf16 %v895_v61, %v893_v55 }
 0x149   : > { %v1365_v63 = vpack.c.bf16 %v663_v60, %v661_v59 }
 0x14a   : > { %1512 = vst [vmem:[%s2229_s15 + $0x30] sm:$0xff] %v1445_v62  }
 0x14b   : > { %1497 = vst [vmem:[%s2232_s12 + $0x30] sm:$0xff] %v1365_v63  }
 0x14c   : > { %v702_v0 = vpop.f32.mrf.mxu2 }
 0x14d   : > { %v703_v2 = vadd.f32 %v2224_v12, %v702_v0  ;;  %v935_v3 = vpop.f32.mrf.mxu3 }
 0x14e   : > { %v1485_v4 = vpack.c.bf16 %v935_v3, %v933_v57  ;;  %v665_v5 = vpop.f32.mrf.mxu0 }
 0x14f   : > { %v1405_v6 = vpack.c.bf16 %v703_v2, %v701_v1  ;;  %v898_v7 = vpop.f32.mrf.mxu1  ;;  %v666_v11 = vadd.f32 %v2224_v12, %v665_v5 }
 0x150   : > { %1520 = vst [vmem:[%s2229_s15 + $0x70] sm:$0xff] %v1485_v4  }
 0x151   : > { %1505 = vst [vmem:[%s2232_s12 + $0x70] sm:$0xff] %v1405_v6  }
 0x154   : > { %v705_v8 = vpop.f32.mrf.mxu2 }
 0x155   : > { %v938_v9 = vpop.f32.mrf.mxu3  ;;  %v706_v18 = vadd.f32 %v2224_v12, %v705_v8 }
 0x156   : > { %v667_v10 = vpop.f32.mrf.mxu0 }
 0x157   : > { %v668_v13 = vadd.f32 %v2224_v12, %v667_v10  ;;  %v900_v14 = vpop.f32.mrf.mxu1 }
 0x158   : > { %v1450_v15 = vpack.c.bf16 %v900_v14, %v898_v7 }
 0x159   : > { %v1370_v16 = vpack.c.bf16 %v668_v13, %v666_v11 }
 0x15a   : > { %1513 = vst [vmem:[%s2229_s15 + $0x38] sm:$0xff] %v1450_v15  }
 0x15b   : > { %1498 = vst [vmem:[%s2232_s12 + $0x38] sm:$0xff] %v1370_v16  }
 0x15c   : > { %v707_v17 = vpop.f32.mrf.mxu2 }
 0x15d   : > { %v708_v20 = vadd.f32 %v2224_v12, %v707_v17  ;;  %v940_v21 = vpop.f32.mrf.mxu3 }
 0x15e   : > { %v1490_v22 = vpack.c.bf16 %v940_v21, %v938_v9 }
 0x15f   : > { %v1410_v23 = vpack.c.bf16 %v708_v20, %v706_v18 }
 0x160   : > { %1521 = vst [vmem:[%s2229_s15 + $0x78] sm:$0xff] %v1490_v22  }
 0x161   : > { %1506 = vst [vmem:[%s2232_s12 + $0x78] sm:$0xff] %v1410_v23  }
 0x162   : > { %1822 = shalt.err (!%p1819_p11)
}
 0x163   : > { %s1925_s10 = smov 64   ;;  %s1926_s15 = smov 4  }
 0x164   : > { %1552 = dma.vmem_to_hbm [thread:$0]  (%p2043_p4), %s2299_s29, 2048, %s1030_s13, %s1008_s8, %s1925_s10, %s1925_s10, %s1926_s15  }
 0x165   : > { %s1013_s12 = scalar_lea.sflag [#allocation13], %s2096_s1  ;;  %s1837_s16 = sshra.s32 %s2307_s5, 4  ;;  %s1838_s16 = int_to_ptr.hbm [resolvable:$true] %s1837_s16 }
 0x166   : > { %s1839_s21 = scalar_lea.hbm %s1838_s16, 128  ;;  %s1843_s14 = scalar_lea.hbm %s2366_s7, 256 }
 0x167   : > { %p1840_p12 = scmp.ne.s32.totalorder %s1838_s16, %s1839_s21  ;;  %p1844_p2 = scmp.lt.s32.totalorder %s1838_s16, %s2366_s7 }
 0x168   : > { %p1845_p9 = scmp.lt.s32.totalorder %s1843_s14, %s1839_s21 }
 0x169   : > { %p1841_p13 = pnand %p1840_p12, %p2043_p4 }
 0x16a   : > { %p1846_p1 = por %p1845_p9, %p1844_p2 }
 0x16b   : > { %p1842_p0 = pneg %p1841_p13 }
 0x16d   : > { %p1847_p3 = pnand %p1846_p1, %p1842_p0 }
 0x16f   : > { %1850 = shalt.err (!%p1847_p3)
}
 0x170   : > { %1553 = dma.vmem_to_hbm [thread:$0]  (%p2043_p4), %s2305_s19, 2048, %s2307_s5, %s1013_s12, %s1925_s10, %s1925_s10, %s1926_s15  }
 0x171 PF: > { %s2399_s1 = sld [smem:[#allocation19_spill]] }
 0x172   : > { %s2401_s13 = sld [smem:[#allocation21_spill]] }
 0x177   : > { %s1063_s8 = sand.u32 1, %s2399_s1  }
 0x178   : > { %p2402_p5 = scmp.ge.s32.totalorder %s2401_s13, 2  ;;  %s1064_s24 = scalar_lea.sflag [#allocation4], %s1063_s8 }
 0x17a   : > { %p1574_p6 = pnand %p2402_p5, %p2051_p7 }
 0x17c   : > { %p1575_p8 = pneg %p1574_p6 }
 0x17e   : > { %1888 = dma.done.wait (%p1575_p8), %s1064_s24, 2048  }
 0x17f   : > { %1890 = vsyncadd (%p1575_p8), %s1064_s24, 4294965248  ;;  %s1074_s3 = scalar_lea.sflag [#allocation13], %s1063_s8 }
 0x180   : > { %1892 = dma.done.wait (%p1575_p8), %s1074_s3, 2048  }
 0x181   : > { %1894 = vsyncadd (%p1575_p8), %s1074_s3, 4294965248  ;;  %s31_s29 = sadd.s32 1, %s2401_s13   ;;  %s2403_s17 = sld [smem:[#allocation20_spill]] }
 0x182   : > { %p28_p10 = scmp.ge.s32.totalorder %s31_s29, 4   ;;  %s2404_s26 = sld [smem:[#allocation24_spill]] }
 0x183   : > { %s2405_s19 = sld [smem:[#allocation22_spill]]  ;;  %s2406_s24 = smov %s1901_s25 }
 0x184   : > { %s2408_s27 = smov %s1913_s28 }
 0x185   :  { %30 = sbr.rel (!%p28_p10) target bundleno = 15 (0xf), region = 138 }
 0x187   : > { %s2407_s25 = smov %s2403_s17 }
 0x189   : > { %s2409_s28 = smov %s2405_s19 }
 0x18a   :  { %1080 = vsyncpa [#allocation3], 1 }
 0x18b   :  { %1082 = vsyncpa [#allocation3 + $0x1], 1 }
 0x18c   :  { %1083 = vsyncpa [#allocation6], 1 }
 0x18d   :  { %1085 = vsyncpa [#allocation6 + $0x1], 1 }
 0x18e   :  { %1086 = vsyncpa [#allocation9], 1 }
 0x18f   :  { %1087 = vsyncpa [#allocation4], 1 }
 0x190   :  { %1089 = vsyncpa [#allocation4 + $0x1], 1 }
 0x191   :  { %1090 = vsyncpa [#allocation13], 1 }
 0x192   :  { %1092 = vsyncpa [#allocation13 + $0x1], 1 }

</bundles_post_ra>
